<compile_context>
chip_gen: v5e
topology: v5e:2x2
jax: 0.10.0
libtpu: 0.0.40
codegen_flags: <defaults>
</compile_context>

<pallas_src>
import functools

import jax
import jax.numpy as jnp
from jax.experimental import pallas as pl
from jax.experimental.pallas import tpu as pltpu


def _round_up(x: int, m: int) -> int:
    return ((x + m - 1) // m) * m


@functools.lru_cache(maxsize=None)
def _roll_moves_up() -> bool:
    """True iff pltpu.roll follows jnp.roll semantics (out[i] = in[i - shift]).

    One-off 1-vreg probe, run eagerly and cached.  Falls back to the documented
    jnp.roll convention if it cannot be evaluated concretely (e.g. under jit).
    """
    def probe(o_ref):
        o_ref[...] = pltpu.roll(
            jax.lax.broadcasted_iota(jnp.int32, (8, 128), 1), shift=1, axis=1)

    try:
        out = pl.pallas_call(
            probe, out_shape=jax.ShapeDtypeStruct((8, 128), jnp.int32))()
        return int(out[0, 1]) == 0
    except Exception:  # conservative fallback (e.g. called under a jit trace)
        return True


def _rotary_dup_kernel(emb_ref, fr_ref, even_ref, cos_ref, sin_ref, *,
                       rows_per_block, shift_up, shift_down):
    """Unique-frequency rotary tile.

    emb_ref  : (tsp//2, 128) block-0 unique angles (resident).
               Row p, lane l = q*d2 + jj holds the angle of
                 sequence row ((p0 + p) * r + q//2)            for even q (top half)
                 sequence row ((p0 + p + tsp//2) * r + q//2)   for odd q  (bottom half)
    fr_ref   : (1, 128)  r * inv_freq[lane % d2]  (resident)
    even_ref : (1, 128)  1.0 on even lane-groups, 0.0 on odd (resident)
    cos_ref/sin_ref : (tsp, 128) lane-dense packed output tiles.
    """
    tsp = cos_ref.shape[0]
    half = tsp // 2

    p0 = (pl.program_id(0) * rows_per_block).astype(jnp.float32)
    u = emb_ref[...] + p0 * fr_ref[...]          # (half, 128) unique angles
    cos_u = jnp.cos(u)
    sin_u = jnp.sin(u)

    evenf = even_ref[...]                        # (1, 128) f32 {0,1}

    def expand(t):
        # Zero the "other" half's groups, then shift the kept d2-wide groups
        # into the adjacent zeroed groups and add: duplicates each unique group
        # into its neighbour using the otherwise-idle XLU roll slot, with no
        # boolean selects on the binding VALU slot.
        t_e = t * evenf                          # top-row groups only
        t_o = t - t_e                            # bottom-row groups only
        top = t_e + pltpu.roll(t_e, shift=shift_up, axis=1)
        bot = t_o + pltpu.roll(t_o, shift=shift_down, axis=1)
        return top, bot

    cos_top, cos_bot = expand(cos_u)
    sin_top, sin_bot = expand(sin_u)
    cos_ref[pl.ds(0, half), :] = cos_top
    cos_ref[pl.ds(half, half), :] = cos_bot
    sin_ref[pl.ds(0, half), :] = sin_top
    sin_ref[pl.ds(half, half), :] = sin_bot


def _rotary_simple_kernel(emb_ref, fr_ref, cos_ref, sin_ref, *, rows_per_block):
    # Fallback (head dims that do not divide 128): direct evaluation.
    p0 = (pl.program_id(0) * rows_per_block).astype(jnp.float32)
    emb = emb_ref[...] + p0 * fr_ref[...]
    cos_ref[...] = jnp.cos(emb)
    sin_ref[...] = jnp.sin(emb)


def rotary_forward(x, dim, base=10000.0, seq_dim=1):
    """Returns (cos, sin), each of shape (seq_len, 1, 1, dim), float32."""
    seq_len = x.shape[seq_dim]
    inv_freq = 1.0 / (base ** (jnp.arange(0, dim, 2, dtype=jnp.float32) / dim))
    d2 = int(inv_freq.shape[0])
    dim_out = 2 * d2                             # == dim for even dim

    use_dup = dim_out <= 128 and 128 % dim_out == 0

    if use_dup:
        r = 128 // dim_out                       # sequence rows per 128-lane row
        sp = -(-seq_len // r)                    # packed output rows needed
        # Tile: multiple of 16 (two aligned halves), >= 2 grid steps when there
        # is enough work (v7x megacore), capped for VMEM on all generations.
        tsp = min(2048, max(16, _round_up(-(-sp // 2), 16)))
        sp_pad = _round_up(sp, tsp)              # whole blocks only (no ragged tail)
        half = tsp // 2

        # Host-built per-lane constants; lane l = q*d2 + jj, q in [0, 2r).
        lane_freq = jnp.tile(inv_freq, 2 * r)                        # (128,)
        q = jnp.repeat(jnp.arange(2 * r), d2)                        # (128,)
        t_row = (q // 2 + (q % 2) * (half * r)).astype(jnp.float32)  # (128,)
        evenf = (1 - q % 2).astype(jnp.float32)[None, :]             # (1, 128)
        p_col = jnp.arange(half, dtype=jnp.float32)[:, None]         # (half, 1)
        emb_base = (p_col * float(r) + t_row[None, :]) * lane_freq[None, :]
        freq_r = (lane_freq * float(r))[None, :]                     # (1, 128)

        shift_up = d2 if _roll_moves_up() else 128 - d2
        kernel = functools.partial(
            _rotary_dup_kernel, rows_per_block=tsp,
            shift_up=shift_up, shift_down=128 - shift_up)
        operands = (emb_base, freq_r, evenf)
        in_specs = [
            pl.BlockSpec((half, 128), lambda i: (0, 0)),   # resident base angles
            pl.BlockSpec((1, 128), lambda i: (0, 0)),      # resident r*inv_freq
            pl.BlockSpec((1, 128), lambda i: (0, 0)),      # resident parity mask
        ]
        out_w = 128
    else:
        # TODO(synk): head dims that do not divide 128 fall back to an unpacked
        # layout (sub-128-lane rows -> masked vst); not hit for typical dims.
        r = 1
        sp = seq_len
        tsp = min(2048, max(8, _round_up(-(-sp // 2), 8)))
        sp_pad = _round_up(sp, tsp)
        full = jnp.concatenate([inv_freq, inv_freq], axis=-1)        # (dim_out,)
        emb_base = jnp.arange(tsp, dtype=jnp.float32)[:, None] * full[None, :]
        freq_r = full[None, :]
        kernel = functools.partial(_rotary_simple_kernel, rows_per_block=tsp)
        operands = (emb_base, freq_r)
        in_specs = [
            pl.BlockSpec((tsp, dim_out), lambda i: (0, 0)),
            pl.BlockSpec((1, dim_out), lambda i: (0, 0)),
        ]
        out_w = dim_out

    grid = (sp_pad // tsp,)
    cos_p, sin_p = pl.pallas_call(
        kernel,
        out_shape=(
            jax.ShapeDtypeStruct((sp_pad, out_w), jnp.float32),
            jax.ShapeDtypeStruct((sp_pad, out_w), jnp.float32),
        ),
        grid_spec=pl.GridSpec(
            grid=grid,
            in_specs=in_specs,
            out_specs=[
                pl.BlockSpec((tsp, out_w), lambda i: (i, 0)),
                pl.BlockSpec((tsp, out_w), lambda i: (i, 0)),
            ],
        ),
        compiler_params=pltpu.CompilerParams(
            dimension_semantics=("parallel",),
        ),
    )(*operands)

    # Free row-major unpack: (sp_pad, r*dim) -> (sp_pad*r, dim) -> slice -> 4D.
    cos = cos_p.reshape(sp_pad * r, dim_out)[:seq_len].reshape(seq_len, 1, 1, dim_out)
    sin = sin_p.reshape(sp_pad * r, dim_out)[:seq_len].reshape(seq_len, 1, 1, dim_out)
    return cos, sin


def _reference(seq_len, dim, base=10000.0):
    inv_freq = 1.0 / (base ** (jnp.arange(0, dim, 2, dtype=jnp.float32) / dim))
    t = jnp.arange(seq_len, dtype=jnp.float32)
    freqs = jnp.einsum("i,j->ij", t, inv_freq)
    emb = jnp.concatenate([freqs, freqs], axis=-1)
    return jnp.cos(emb)[:, None, None, :], jnp.sin(emb)[:, None, None, :]


if __name__ == "__main__":
    key = jax.random.PRNGKey(0)
    dim = 32
    # x: (batch, seq, heads, dim) with default seq_dim=1.
    x = jax.random.normal(key, (2, 8, 4, dim), dtype=jnp.float32)

    cos, sin = rotary_forward(x, dim=dim, base=10000.0, seq_dim=1)
    jax.block_until_ready((cos, sin))

    cos_ref, sin_ref = _reference(8, dim)
    assert cos.shape == (8, 1, 1, dim) and sin.shape == (8, 1, 1, dim)
    assert jnp.allclose(cos, cos_ref, atol=1e-5), "cos mismatch (small)"
    assert jnp.allclose(sin, sin_ref, atol=1e-5), "sin mismatch (small)"

    # Ragged / multi-step check: seq_len not divisible by 128//dim and spanning
    # two grid steps (exercises packing pad, block pad and both tile halves).
    seq2 = 250
    x2 = jnp.zeros((1, seq2, 1, dim), dtype=jnp.float32)
    cos2, sin2 = rotary_forward(x2, dim=dim)
    jax.block_until_ready((cos2, sin2))
    cos2_ref, sin2_ref = _reference(seq2, dim)
    assert cos2.shape == (seq2, 1, 1, dim)
    # Slightly looser tolerance: angles up to ~250 rad; the split-product angle
    # formulation differs from the reference by ~1-2 ulp of the angle.
    assert jnp.allclose(cos2, cos2_ref, atol=2e-4), "cos mismatch (ragged)"
    assert jnp.allclose(sin2, sin2_ref, atol=2e-4), "sin mismatch (ragged)"

    print("KERNEL_OK")
</pallas_src>

<mosaic_0001>
module attributes {stable_mosaic.version = 11 : i64} {
  func.func @_rotary_dup_kernel(%arg0: i32, %arg1: memref<8x128xf32, #tpu.memory_space<vmem>>, %arg2: memref<1x128xf32, #tpu.memory_space<vmem>>, %arg3: memref<1x128xf32, #tpu.memory_space<vmem>>, %arg4: memref<16x128xf32, #tpu.memory_space<vmem>>, %arg5: memref<16x128xf32, #tpu.memory_space<vmem>>) attributes {dimension_semantics = [#tpu.dimension_semantics<parallel>], iteration_bounds = array<i64: 1>, scalar_prefetch = 0 : i64, scratch_operands = 0 : i64, tpu.core_type = #tpu.core_type<tc>, window_params = [{pipeline_mode = #tpu.pipeline_mode<synchronous>, transform_indices = @transform_0, window_bounds = array<i64: 8, 128>}, {pipeline_mode = #tpu.pipeline_mode<synchronous>, transform_indices = @transform_1, window_bounds = array<i64: 1, 128>}, {pipeline_mode = #tpu.pipeline_mode<synchronous>, transform_indices = @transform_2, window_bounds = array<i64: 1, 128>}, {transform_indices = @transform_3, window_bounds = array<i64: 16, 128>}, {transform_indices = @transform_4, window_bounds = array<i64: 16, 128>}]} {
    %c16_i32 = arith.constant 16 : i32
    %0 = arith.muli %arg0, %c16_i32 : i32
    %1 = arith.sitofp %0 : i32 to f32
    %c0 = arith.constant 0 : index
    %c0_0 = arith.constant 0 : index
    %2 = vector.load %arg1[%c0, %c0_0] : memref<8x128xf32, #tpu.memory_space<vmem>>, vector<8x128xf32>
    %c0_1 = arith.constant 0 : index
    %c0_2 = arith.constant 0 : index
    %3 = vector.load %arg2[%c0_1, %c0_2] : memref<1x128xf32, #tpu.memory_space<vmem>>, vector<1x128xf32>
    %4 = vector.broadcast %1 : f32 to vector<1x128xf32>
    %5 = arith.mulf %4, %3 : vector<1x128xf32>
    %6 = vector.broadcast %5 : vector<1x128xf32> to vector<8x128xf32>
    %7 = arith.addf %2, %6 : vector<8x128xf32>
    %8 = math.cos %7 : vector<8x128xf32>
    %9 = math.sin %7 : vector<8x128xf32>
    %c0_3 = arith.constant 0 : index
    %c0_4 = arith.constant 0 : index
    %10 = vector.load %arg3[%c0_3, %c0_4] : memref<1x128xf32, #tpu.memory_space<vmem>>, vector<1x128xf32>
    %11 = vector.broadcast %10 : vector<1x128xf32> to vector<8x128xf32>
    %12 = arith.mulf %8, %11 : vector<8x128xf32>
    %13 = arith.subf %8, %12 : vector<8x128xf32>
    %c16_i32_5 = arith.constant 16 : i32
    %14 = tpu.dynamic_rotate %12 by %c16_i32_5 dim 1 : vector<8x128xf32>, i32 -> vector<8x128xf32>
    %15 = arith.addf %12, %14 : vector<8x128xf32>
    %c112_i32 = arith.constant 112 : i32
    %16 = tpu.dynamic_rotate %13 by %c112_i32 dim 1 : vector<8x128xf32>, i32 -> vector<8x128xf32>
    %17 = arith.addf %13, %16 : vector<8x128xf32>
    %18 = vector.broadcast %10 : vector<1x128xf32> to vector<8x128xf32>
    %19 = arith.mulf %9, %18 : vector<8x128xf32>
    %20 = arith.subf %9, %19 : vector<8x128xf32>
    %c16_i32_6 = arith.constant 16 : i32
    %21 = tpu.dynamic_rotate %19 by %c16_i32_6 dim 1 : vector<8x128xf32>, i32 -> vector<8x128xf32>
    %22 = arith.addf %19, %21 : vector<8x128xf32>
    %c112_i32_7 = arith.constant 112 : i32
    %23 = tpu.dynamic_rotate %20 by %c112_i32_7 dim 1 : vector<8x128xf32>, i32 -> vector<8x128xf32>
    %24 = arith.addf %20, %23 : vector<8x128xf32>
    %c0_8 = arith.constant 0 : index
    %c0_9 = arith.constant 0 : index
    %25 = vector.load %arg4[%c0_8, %c0_9] : memref<16x128xf32, #tpu.memory_space<vmem>>, vector<8x128xf32>
    tpu.vector_store %arg4[%c0_8, %c0_9], %15 {strides = array<i32>} : memref<16x128xf32, #tpu.memory_space<vmem>>, vector<8x128xf32>,
    %c8 = arith.constant 8 : index
    %c0_10 = arith.constant 0 : index
    %26 = vector.load %arg4[%c8, %c0_10] : memref<16x128xf32, #tpu.memory_space<vmem>>, vector<8x128xf32>
    tpu.vector_store %arg4[%c8, %c0_10], %17 {strides = array<i32>} : memref<16x128xf32, #tpu.memory_space<vmem>>, vector<8x128xf32>,
    %c0_11 = arith.constant 0 : index
    %c0_12 = arith.constant 0 : index
    %27 = vector.load %arg5[%c0_11, %c0_12] : memref<16x128xf32, #tpu.memory_space<vmem>>, vector<8x128xf32>
    tpu.vector_store %arg5[%c0_11, %c0_12], %22 {strides = array<i32>} : memref<16x128xf32, #tpu.memory_space<vmem>>, vector<8x128xf32>,
    %c8_13 = arith.constant 8 : index
    %c0_14 = arith.constant 0 : index
    %28 = vector.load %arg5[%c8_13, %c0_14] : memref<16x128xf32, #tpu.memory_space<vmem>>, vector<8x128xf32>
    tpu.vector_store %arg5[%c8_13, %c0_14], %24 {strides = array<i32>} : memref<16x128xf32, #tpu.memory_space<vmem>>, vector<8x128xf32>,
    return
  }
  func.func @transform_0(%arg0: i32) -> (i32, i32) {
    %c0_i32 = arith.constant 0 : i32
    %c0_i32_0 = arith.constant 0 : i32
    %c0_i32_1 = arith.constant 0 : i32
    return %c0_i32, %c0_i32_0 : i32, i32
  }
  func.func @transform_1(%arg0: i32) -> (i32, i32) {
    %c0_i32 = arith.constant 0 : i32
    %c0_i32_0 = arith.constant 0 : i32
    %c0_i32_1 = arith.constant 0 : i32
    return %c0_i32, %c0_i32_0 : i32, i32
  }
  func.func @transform_2(%arg0: i32) -> (i32, i32) {
    %c0_i32 = arith.constant 0 : i32
    %c0_i32_0 = arith.constant 0 : i32
    %c0_i32_1 = arith.constant 0 : i32
    return %c0_i32, %c0_i32_0 : i32, i32
  }
  func.func @transform_3(%arg0: i32) -> (i32, i32) {
    %c0_i32 = arith.constant 0 : i32
    %c0_i32_0 = arith.constant 0 : i32
    return %arg0, %c0_i32 : i32, i32
  }
  func.func @transform_4(%arg0: i32) -> (i32, i32) {
    %c0_i32 = arith.constant 0 : i32
    %c0_i32_0 = arith.constant 0 : i32
    return %arg0, %c0_i32 : i32, i32
  }
}

</mosaic_0001>

<bundles_post_ra>
// kernel: tpu_custom_call.1
= control target key start
LH: loop header
LB: loop body
LE: loop exit
PB: predicated region body
PF: predicated region fallthrough
CT: control target
= control target key end

     0   :  { %10 = vsyncpa [#allocation3], 0  ;;  %s654_s0 = inlined_call_operand.hbm [shape: f32[8,128], index: 0, kind: input, shape index: {}]   ;;  %s655_s1 = inlined_call_operand.hbm [shape: f32[1,128], index: 1, kind: input, shape index: {}]   ;;  %s656_s2 = inlined_call_operand.vmem [shape: f32[1,128], index: 2, kind: input, shape index: {}]   ;;  %s657_s3 = inlined_call_operand.hbm [shape: f32[16,128], index: 3, kind: output, shape index: {0}]   ;;  %s658_s4 = inlined_call_operand.hbm [shape: f32[16,128], index: 4, kind: output, shape index: {1}]  }
   0x1   :  { %11 = vsyncpa [#allocation6], 0 }
   0x2   :  { %12 = vsyncpa [#allocation4], 0 }
   0x3   :  { %13 = vsyncpa [#allocation9], 0  ;;  %s19_s17 = sshll.u32 %s654_s0, 4  ;;  %s553_s18 = smov [#allocation2]   ;;  %s20_s17 = int_to_ptr.hbm [resolvable:$true] %s19_s17 }
   0x4   :  { %s21_s19 = sshll.u32 %s553_s18, 4  ;;  %s30_s22 = sshll.u32 %s655_s1, 4  ;;  %s22_s19 = int_to_ptr.vmem [resolvable:$true] %s21_s19  ;;  %s31_s22 = int_to_ptr.hbm [resolvable:$true] %s30_s22 }
   0x5   :  { %24 = dma.hbm_to_vmem [thread:$0]  %s20_s17, 128, %s22_s19, [#allocation3]  }
   0x6   :  { %s554_s23 = smov [#allocation5]  }
   0x7   :  { %s32_s24 = sshll.u32 %s554_s23, 4  ;;  %s33_s24 = int_to_ptr.vmem [resolvable:$true] %s32_s24 }
   0x8   :  { %35 = dma.hbm_to_vmem [thread:$0]  %s31_s22, 16, %s33_s24, [#allocation6]  }
   0x9   :  { %545 = dma.done.wait [#allocation3], 128  }
   0xa   :  { %546 = vsyncadd [#allocation3], 4294967168 }
   0xb   :  { %547 = dma.done.wait [#allocation6], 16  }
   0xc   :  { %548 = vsyncadd [#allocation6], 4294967280  ;;  %v49_v0 = vld [vmem:[#allocation5] sm:$0x1]  ;;  %v48_v2 = vld [vmem:[#allocation2] sm:$0xff]  ;;  %s562_s25 = smov 16  }
   0xd   :  { %v51_v1 = vmul.f32 0.0, %v49_v0  ;;  %v555_v16 = vmov 683565275   ;;  %v556_v18 = vmov 2475754826   ;;  %s563_s26 = smov 112  }
   0xe   :  { %v557_v20 = vmov 2131351028   ;;  %v558_v22 = vmov 2102212464   ;;  %v559_v24 = vmov 920167782  }
   0xf   :  { %v53_v3 = vperm.slane %v51_v1, 0  ;;  %v560_v30 = vmov 1326507024   ;;  %s408_s30 = sshll.u32 %s658_s4, 4  ;;  %s565_s5 = smov [#allocation7]   ;;  %s409_s30 = int_to_ptr.hbm [resolvable:$true] %s408_s30 }
  0x10   :  { %s393_s6 = sshll.u32 %s565_s5, 4  ;;  %s395_s9 = sshll.u32 %s657_s3, 4  ;;  %s394_s6 = int_to_ptr.vmem [resolvable:$true] %s393_s6  ;;  %s396_s9 = int_to_ptr.hbm [resolvable:$true] %s395_s9 }
  0x11   :  { %v599_v4 = vadd.f32 %v53_v3, %v48_v2  ;;  %s566_s10 = smov 128   ;;  %s567_s11 = smov 8  }
  0x13   :  { %v59_v5 = vand.u32 2139095040, %v599_v4  ;;  %v56_v7 = vand.u32 2147483647, %v599_v4  ;;  %vm58_vm12 = vcmp.lt.s32.totalorder %v599_v4, 0 }
  0x15   :  { %v60_v6 = vshrl.u32 %v59_v5, 23  ;;  %v63_v10 = vand.u32 8388607, %v56_v7  ;;  %v561_v5 = vmov 0   ;;  %vm57_vm13 = vcmp.le.f32.partialorder %v56_v7, 0.7853982 }
  0x17   :  { %v427_v8 = vadd.s32 4294967169, %v60_v6  ;;  %v64_v13 = vor.u32 8388608, %v63_v10 }
  0x19   :  { %v66_v9 = vadd.s32 1, %v427_v8  ;;  %v608_v32 = vshll.u32 %v64_v13, 8 }
  0x1b   :  { %vm67_vm0 = vcmp.gt.s32.totalorder %v66_v9, 0  ;;  %v105_v44 = vand.u32 65535, %v608_v32  ;;  %v106_v45 = vshrl.u32 %v608_v32, 16 }
  0x1c   :  { %v68_v11 = vsel %vm67_vm0, %v66_v9, 0 }
  0x1d   :  { %v70_v12 = vand.u32 31, %v68_v11  ;;  %v605_v14 = vshrl.u32 %v68_v11, 5 }
  0x1f   :  { %v71_v15 = vsub.s32 32, %v70_v12  ;;  %v73_v17 = vshll.u32 %v555_v16, %v70_v12  ;;  %v76_v19 = vshll.u32 %v556_v18, %v70_v12  ;;  %v79_v21 = vshll.u32 %v557_v20, %v70_v12 }
  0x20   :  { %v82_v23 = vshll.u32 %v558_v22, %v70_v12  ;;  %v85_v25 = vshll.u32 %v559_v24, %v70_v12  ;;  %vm88_vm1 = vcmp.lt.s32.totalorder %v605_v14, 1  ;;  %vm91_vm2 = vcmp.lt.s32.totalorder %v605_v14, 4 }
  0x21   :  { %v74_v26 = vshrl.u32 %v556_v18, %v71_v15  ;;  %v77_v27 = vshrl.u32 %v557_v20, %v71_v15  ;;  %v80_v28 = vshrl.u32 %v558_v22, %v71_v15  ;;  %v83_v29 = vshrl.u32 %v559_v24, %v71_v15 }
  0x22   :  { %v86_v31 = vshrl.u32 %v560_v30, %v71_v15  ;;  %vm90_vm3 = vcmp.lt.s32.totalorder %v605_v14, 3  ;;  %vm89_vm4 = vcmp.lt.s32.totalorder %v605_v14, 2  ;;  %v72_v52 = vshrl.u32 %v555_v16, %v71_v15 }
  0x23   :  { %v75_v33 = vor.u32 %v74_v26, %v73_v17  ;;  %v78_v34 = vor.u32 %v77_v27, %v76_v19  ;;  %v81_v35 = vor.u32 %v80_v28, %v79_v21  ;;  %v84_v36 = vor.u32 %v83_v29, %v82_v23 }
  0x24   :  { %v87_v37 = vor.u32 %v86_v31, %v85_v25 }
  0x25   :  { %v96_v38 = vsel %vm88_vm1, %v75_v33, %v78_v34  ;;  %v100_v39 = vsel %vm88_vm1, %v78_v34, %v81_v35  ;;  %v97_v40 = vsel %vm91_vm2, %v84_v36, 920167782  ;;  %v92_v1 = vsel %vm88_vm1, %v72_v52, %v75_v33 }
  0x26   :  { %v101_v41 = vsel %vm91_vm2, %v87_v37, 1326507024  ;;  %v98_v42 = vsel %vm90_vm3, %v81_v35, %v97_v40  ;;  %v93_v3 = vsel %vm91_vm2, %v81_v35, 2102212464 }
  0x27   :  { %v102_v43 = vsel %vm90_vm3, %v84_v36, %v101_v41  ;;  %v99_v46 = vsel %vm89_vm4, %v96_v38, %v98_v42  ;;  %v94_v16 = vsel %vm90_vm3, %v78_v34, %v93_v3 }
  0x28   :  { %v103_v47 = vsel %vm89_vm4, %v100_v39, %v102_v43  ;;  %v129_v50 = vand.u32 65535, %v99_v46  ;;  %v130_v51 = vshrl.u32 %v99_v46, 16  ;;  %v95_v24 = vsel %vm89_vm4, %v92_v1, %v94_v16 }
  0x29   :  { %v107_v48 = vand.u32 65535, %v103_v47  ;;  %v108_v49 = vshrl.u32 %v103_v47, 16  ;;  %v149_v28 = vmul.u32 %v608_v32, %v95_v24  ;;  %vm199_vm4 = vweird.f32 %v599_v4 }
  0x2a   :  { %v131_v56 = vmul.u32 %v129_v50, %v105_v44  ;;  %v132_v57 = vmul.u32 %v130_v51, %v105_v44  ;;  %v133_v58 = vmul.u32 %v129_v50, %v106_v45  ;;  %v134_v62 = vmul.u32 %v130_v51, %v106_v45 }
  0x2b   :  { %v109_v53 = vmul.u32 %v107_v48, %v105_v44  ;;  %v110_v54 = vmul.u32 %v108_v49, %v105_v44  ;;  %v111_v55 = vmul.u32 %v107_v48, %v106_v45  ;;  %v112_v59 = vmul.u32 %v108_v49, %v106_v45 }
  0x2c   :  { %v135_v63 = vshll.u32 %v132_v57, 16  ;;  %v137_v0 = vshll.u32 %v133_v58, 16  ;;  %v136_v13 = vshrl.u32 %v132_v57, 16  ;;  %v138_v20 = vshrl.u32 %v133_v58, 16 }
  0x2d   :  { %v113_v60 = vshll.u32 %v110_v54, 16  ;;  %v115_v61 = vshll.u32 %v111_v55, 16  ;;  %v114_v9 = vshrl.u32 %v110_v54, 16  ;;  %v116_v17 = vshrl.u32 %v111_v55, 16 }
  0x2e   :  { %vm139_vm6 = vc.u32 %v131_v56, %v135_v63  ;;  %v141_v8 = vadd.s32 %v135_v63, %v131_v56 }
  0x2f   :  { %vm117_vm5 = vc.u32 %v109_v53, %v113_v60  ;;  %v119_v2 = vadd.s32 %v113_v60, %v109_v53  ;;  %v140_v11 = vsel %vm139_vm6, 1, %v561_v5 }
  0x30   :  { %v118_v6 = vsel %vm117_vm5, 1, %v561_v5  ;;  %v142_v15 = vadd.s32 %v140_v11, %v134_v62  ;;  %vm143_vm8 = vc.u32 %v141_v8, %v137_v0  ;;  %v145_v23 = vadd.s32 %v141_v8, %v137_v0 }
  0x31   :  { %v120_v10 = vadd.s32 %v118_v6, %v112_v59  ;;  %vm121_vm7 = vc.u32 %v119_v2, %v115_v61  ;;  %v144_v19 = vsel %vm143_vm8, 1, %v561_v5 }
  0x32   :  { %v122_v12 = vsel %vm121_vm7, 1, %v561_v5  ;;  %v146_v21 = vadd.s32 %v144_v19, %v142_v15 }
  0x33   :  { %v124_v18 = vadd.s32 %v122_v12, %v120_v10 }
  0x34   :  { %v147_v25 = vadd.s32 %v146_v21, %v136_v13 }
  0x35   :  { %v125_v22 = vadd.s32 %v124_v18, %v114_v9 }
  0x36   :  { %v148_v27 = vadd.s32 %v147_v25, %v138_v20 }
  0x37   :  { %v126_v26 = vadd.s32 %v125_v22, %v116_v17  ;;  %v448_v17 = vld [vmem:[%s656_s2] ss:$0 sm:$0xff]  ;;  %s564_s2 = smov [#allocation8]  }
  0x38   :  { %v152_v29 = vadd.s32 1, %v148_v27  ;;  %s406_s27 = sshll.u32 %s564_s2, 4  ;;  %s407_s27 = int_to_ptr.vmem [resolvable:$true] %s406_s27 }
  0x39   :  { %vm151_vm9 = vc.u32 %v126_v26, %v145_v23  ;;  %v150_v14 = vadd.s32 %v145_v23, %v126_v26 }
  0x3a   :  { %v153_v30 = vsel %vm151_vm9, %v152_v29, %v148_v27 }
  0x3b   :  { %v154_v31 = vadd.s32 %v153_v30, %v149_v28 }
  0x3d   :  { %v155_v33 = vadd.s32 536870912, %v154_v31 }
  0x3f   :  { %v156_v34 = vshrl.u32 %v155_v33, 30 }
  0x41   :  { %v157_v35 = vshll.u32 %v156_v34, 30  ;;  %v180_v52 = vsub.s32 4, %v156_v34 }
  0x43   :  { %v158_v36 = vsub.s32 %v154_v31, %v157_v35  ;;  %v181_v55 = vsel %vm58_vm12, %v180_v52, %v156_v34 }
  0x44   :  { %v183_v58 = vsel %vm57_vm13, 0, %v181_v55 }
  0x45   :  { %vm159_vm10 = vcmp.lt.s32.totalorder %v158_v36, 0  ;;  %v160_v37 = vsub.s32 0, %v158_v36  ;;  %v354_v63 = vadd.s32 3, %v183_v58  ;;  %v200_v6 = vand.u32 3, %v183_v58 }
  0x47   :  { %v161_v38 = vsel %vm159_vm10, %v160_v37, %v158_v36  ;;  %v355_v5 = vand.u32 3, %v354_v63  ;;  %vm205_vm15 = vcmp.eq.s32.totalorder %v200_v6, 2  ;;  %vm202_vm2 = vcmp.eq.s32.totalorder %v200_v6, 0 }
  0x48   :  { %v162_v39 = vclz %v161_v38  ;;  %vm201_vm3 = vcmp.lt.s32.totalorder %v200_v6, 2 }
  0x49   :  { %vm360_vm14 = vcmp.eq.s32.totalorder %v355_v5, 2  ;;  %vm356_vm0 = vcmp.lt.s32.totalorder %v355_v5, 2  ;;  %vm357_vm1 = vcmp.eq.s32.totalorder %v355_v5, 0 }
  0x4a   :  { %v428_v40 = vadd.s32 4294967294, %v162_v39 }
  0x4c   :  { %vm429_vm11 = vcmp.lt.s32.totalorder %v428_v40, 0 }
  0x4d   :  { %v165_v41 = vsel %vm429_vm11, 0, %v428_v40 }
  0x4e   :  { %v166_v42 = vsub.s32 32, %v165_v41  ;;  %v167_v43 = vshll.u32 %v158_v36, %v165_v41  ;;  %v170_v44 = vsub.s32 4294967266, %v165_v41 }
  0x50   :  { %v168_v32 = vshrl.u32 %v150_v14, %v166_v42  ;;  %v171_v45 = vadd.s32 127, %v170_v44 }
  0x52   :  { %v169_v46 = vor.u32 %v168_v32, %v167_v43  ;;  %v172_v47 = vshll.u32 %v171_v45, 23 }
  0x54   :  { %v173_v48 = vor.u32 4788187, %v172_v47  ;;  %v176_v49 = vcvt.s32.f32 %v169_v46 }
  0x56   :  { %v174_v50 = vand.u32 2147483647, %v173_v48 }
  0x58   :  { %v177_v51 = vmul.f32 %v176_v49, %v174_v50 }
  0x5a   :  { %v178_v53 = vxor.u32 2147483648, %v177_v51 }
  0x5c   :  { %v179_v54 = vsel %vm58_vm12, %v178_v53, %v177_v51 }
  0x5d   :  { %v182_v56 = vsel %vm57_vm13, %v599_v4, %v179_v54 }
  0x5e   :  { %v184_v57 = vmul.f32 %v182_v56, %v182_v56 }
  0x60   :  { %v185_v59 = vmul.f32 -0.001358992, %v184_v57  ;;  %v192_v60 = vmul.f32 -0.00019511016, %v184_v57 }
  0x62   :  { %v186_v61 = vadd.f32 0.041655596, %v185_v59  ;;  %v193_v62 = vadd.f32 0.008332121, %v192_v60 }
  0x64   :  { %v187_v0 = vmul.f32 %v186_v61, %v184_v57  ;;  %v194_v1 = vmul.f32 %v193_v62, %v184_v57 }
  0x66   :  { %v188_v2 = vadd.f32 -0.4999988, %v187_v0  ;;  %v195_v3 = vadd.f32 -0.16666654, %v194_v1 }
  0x68   :  { %v189_v8 = vmul.f32 %v188_v2, %v184_v57  ;;  %v196_v7 = vmul.f32 %v195_v3, %v184_v57 }
  0x6a   :  { %v190_v9 = vadd.f32 1.0, %v189_v8  ;;  %v197_v10 = vadd.f32 1.0, %v196_v7 }
  0x6c   :  { %v198_v11 = vmul.f32 %v197_v10, %v182_v56  ;;  %v206_v12 = vxor.u32 2147483648, %v190_v9 }
  0x6e   :  { %v203_v13 = vxor.u32 2147483648, %v198_v11  ;;  %v362_v15 = vsel %vm360_vm14, %v206_v12, %v198_v11  ;;  %v207_v16 = vsel %vm205_vm15, %v206_v12, %v198_v11 }
  0x70   :  { %v359_v18 = vsel %vm357_vm1, %v190_v9, %v203_v13  ;;  %v204_v19 = vsel %vm202_vm2, %v190_v9, %v203_v13 }
  0x71   :  { %v363_v20 = vsel %vm356_vm0, %v359_v18, %v362_v15  ;;  %v208_v21 = vsel %vm201_vm3, %v204_v19, %v207_v16 }
  0x72   :  { %v364_v22 = vsel %vm199_vm4, nan, %v363_v20  ;;  %v209_v23 = vsel %vm199_vm4, nan, %v208_v21 }
  0x73   :  { %v377_v24 = vmul.f32 %v448_v17, %v364_v22  ;;  %v369_v25 = vmul.f32 %v448_v17, %v209_v23 }
  0x75   :  { %379 = vrot.lane.b32.xlu1 %v377_v24, %s562_s25  ;;  %371 = vrot.lane.b32.xlu0 %v369_v25, %s562_s25  ;;  %v378_v26 = vsub.f32 %v364_v22, %v377_v24  ;;  %v370_v27 = vsub.f32 %v209_v23, %v369_v25 }
  0x7d   :  { %382 = vrot.lane.b32.xlu1 %v378_v26, %s563_s26  ;;  %374 = vrot.lane.b32.xlu0 %v370_v27, %s563_s26 }
  0xe7   :  { %v380_v4 = vpop.permute.xlu1 %379  ;;  %v372_v28 = vpop.permute.xlu0 %371 }
  0xe8   :  { %v381_v29 = vadd.f32 %v380_v4, %v377_v24  ;;  %v373_v30 = vadd.f32 %v372_v28, %v369_v25 }
  0xea   :  { %387 = vst [vmem:[#allocation8] sm:$0xff] %v381_v29 }
  0xeb   :  { %385 = vst [vmem:[#allocation7] sm:$0xff] %v373_v30 }
  0xef   :  { %v383_v31 = vpop.permute.xlu1 %382  ;;  %v375_v33 = vpop.permute.xlu0 %374 }
  0xf0   :  { %v384_v34 = vadd.f32 %v383_v31, %v378_v26  ;;  %v376_v35 = vadd.f32 %v375_v33, %v370_v27 }
  0xf2   :  { %388 = vst [vmem:[#allocation8 + $0x8] sm:$0xff] %v384_v34 }
  0xf3   :  { %386 = vst [vmem:[#allocation7 + $0x8] sm:$0xff] %v376_v35  ;;  %414 = dma.vmem_to_hbm [thread:$0]  %s407_s27, 256, %s409_s30, [#allocation9], %s566_s10, %s566_s10, %s567_s11  }
  0xf4   :  { %401 = dma.vmem_to_hbm [thread:$0]  %s394_s6, 256, %s396_s9, [#allocation4], %s566_s10, %s566_s10, %s567_s11  }
  0xf5   :  { %549 = dma.done.wait [#allocation4], 256  }
  0xf6   :  { %550 = vsyncadd [#allocation4], 4294967040 }
  0xf7   :  { %551 = dma.done.wait [#allocation9], 256  }
  0xf8   :  { %552 = vsyncadd [#allocation9], 4294967040 }
  0xf9   :  { %423 = vsyncpa [#allocation3], 1 }
  0xfa   :  { %424 = vsyncpa [#allocation6], 1 }
  0xfb   :  { %425 = vsyncpa [#allocation4], 1 }
  0xfc   :  { %426 = vsyncpa [#allocation9], 1 }

</bundles_post_ra>
